<compile_context>
chip_gen: v7x
topology: tpu7x:2x2x1
jax: 0.10.0
libtpu: 0.0.40
codegen_flags: <defaults>
</compile_context>

<pallas_src>
import functools

import jax
import jax.numpy as jnp
from jax.experimental import pallas as pl
from jax.experimental.pallas import tpu as pltpu


# ----------------------------------------------------------------------------
# Kernel (one batch tile per grid step; all params VMEM-resident)
# ----------------------------------------------------------------------------
def ae_kernel(*refs):
    # inputs : x (bf16), eps (f32, lane-padded latent), enc (w0,b0..w4,b4),
    #          dec (w0,b0..w4,b4)   [weights bf16, biases f32]
    # outputs: mu (lane-padded latent, f32), decoded (f32)
    x_ref, eps_ref = refs[0], refs[1]
    enc = refs[2:12]
    dec = refs[12:22]
    mu_ref, out_ref = refs[22], refs[23]

    def linear(h, w_ref, b_ref):
        w = w_ref[...]
        # bf16 MXU inputs, f32 accumulation, f32 bias add.
        return jnp.dot(h.astype(w.dtype), w,
                       preferred_element_type=jnp.float32) + b_ref[...]

    # -------------------- encoder --------------------
    h = x_ref[...]                                        # already bf16
    for li in range(4):                                   # Linear+ReLU x4
        h = jnp.maximum(linear(h, enc[2 * li], enc[2 * li + 1]), 0.0)
    encoded = linear(h, enc[8], enc[9])                   # (TB, LAT); lanes >= NF are exactly 0

    mu_ref[...] = encoded                                 # mu (== logvar in this model)

    # -------------------- reparameterize --------------------
    # z = mu + eps * exp(0.5 * logvar); eps ~ N(0,1) supplied from the host.
    std = jnp.exp(0.5 * encoded)
    z = encoded + eps_ref[...] * std                      # padded lanes stay exactly 0

    # -------------------- decoder --------------------
    d = z
    for li in range(4):                                   # Linear+ReLU x4
        d = jnp.maximum(linear(d, dec[2 * li], dec[2 * li + 1]), 0.0)
    d = linear(d, dec[8], dec[9])                         # final Linear
    out_ref[...] = jax.nn.sigmoid(d)                      # Sigmoid


# ----------------------------------------------------------------------------
# Wrapper
# ----------------------------------------------------------------------------
def _round_up(n, m):
    return ((n + m - 1) // m) * m


@functools.partial(jax.jit, static_argnames=("tb",))
def ae_forward(x, eps, enc_params, dec_params, *, tb=1024):
    """Fused AE forward. Returns (mu, logvar, decoded); logvar is mu."""
    B, I = x.shape
    NF = enc_params[-1][0].shape[1]
    O = dec_params[-1][0].shape[1]
    LAT = _round_up(NF, 8)                                # latent lane padding (3 -> 8)

    # Batch tile: multiple of the f32 sublane (8), at most tb, and small enough
    # that the grid keeps >=4 tiles when possible (v7x 2-TC megacore + pipelining).
    tb_eff = min(tb, max(8, _round_up(-(-B // 4), 8)))
    Bp = _round_up(B, tb_eff)
    grid = (Bp // tb_eff,)

    # ---- activations: bf16 x, lane-padded f32 eps; batch-pad only if needed ----
    x_p = x.astype(jnp.bfloat16)
    eps_p = jnp.pad(eps.astype(jnp.float32), ((0, 0), (0, LAT - NF)))
    if Bp != B:
        x_p = jnp.pad(x_p, ((0, Bp - B), (0, 0)))
        eps_p = jnp.pad(eps_p, ((0, Bp - B), (0, 0)))

    # ---- parameters: bf16 weights (f32 accumulate in-kernel), f32 biases ----
    enc = [(w.astype(jnp.bfloat16), b.astype(jnp.float32)) for w, b in enc_params]
    dec = [(w.astype(jnp.bfloat16), b.astype(jnp.float32)) for w, b in dec_params]
    # Lane-pad the latent head/tail so mu, eps and z share LAT dense lanes
    # (exact: zero weight columns/rows and zero bias in the padded lanes).
    w4e, b4e = enc[-1]
    enc[-1] = (jnp.pad(w4e, ((0, 0), (0, LAT - NF))),
               jnp.pad(b4e, ((0, 0), (0, LAT - NF))))
    w0d, b0d = dec[0]
    dec[0] = (jnp.pad(w0d, ((0, LAT - NF), (0, 0))), b0d)

    flat = []
    for w, b in enc + dec:
        flat += [w, b]

    def tiled(shape):
        return pl.BlockSpec(shape, lambda b: (b, 0))      # batch-tiled activations

    def resident(shape):
        return pl.BlockSpec(shape, lambda b: (0, 0))      # VMEM-resident params

    in_specs = [tiled((tb_eff, I)), tiled((tb_eff, LAT))]
    in_specs += [resident(p.shape) for p in flat]

    mu_pad, dec_pad = pl.pallas_call(
        ae_kernel,
        grid=grid,
        out_shape=(
            jax.ShapeDtypeStruct((Bp, LAT), jnp.float32),
            jax.ShapeDtypeStruct((Bp, O), jnp.float32),
        ),
        in_specs=in_specs,
        out_specs=(tiled((tb_eff, LAT)), tiled((tb_eff, O))),
        compiler_params=pltpu.CompilerParams(
            dimension_semantics=("parallel",),
            vmem_limit_bytes=48 * 1024 * 1024),
    )(x_p, eps_p, *flat)

    mu = mu_pad[:B, :NF]
    decoded = dec_pad[:B, :] if Bp != B else dec_pad
    # The module returns logvar == mu (same tensor); no second output DMA.
    return mu, mu, decoded


# ----------------------------------------------------------------------------
# Deterministic parameter init (PyTorch nn.Linear-style uniform)
# ----------------------------------------------------------------------------
def init_linear(key, fan_in, fan_out):
    kw, kb = jax.random.split(key)
    bound = 1.0 / jnp.sqrt(float(fan_in))
    w = jax.random.uniform(kw, (fan_in, fan_out), jnp.float32, -bound, bound)
    b = jax.random.uniform(kb, (1, fan_out), jnp.float32, -bound, bound)
    return w, b


def make_params(key, i, n_features, o):
    enc_dims = [(i, 128), (128, 64), (64, 32), (32, 16), (16, n_features)]
    dec_dims = [(n_features, 16), (16, 32), (32, 64), (64, 128), (128, o)]
    keys = jax.random.split(key, len(enc_dims) + len(dec_dims))
    enc = [init_linear(k, fi, fo) for k, (fi, fo) in zip(keys[:5], enc_dims)]
    dec = [init_linear(k, fi, fo) for k, (fi, fo) in zip(keys[5:], dec_dims)]
    return enc, dec


# ----------------------------------------------------------------------------
# Pure-JAX reference (mirrors the kernel's bf16-weight / f32-accumulate math)
# ----------------------------------------------------------------------------
def ae_reference(x, eps, enc_params, dec_params):
    def linear(h, w, b):
        return jnp.dot(h.astype(jnp.bfloat16), w.astype(jnp.bfloat16),
                       preferred_element_type=jnp.float32) + b

    h = x
    for w, b in enc_params[:-1]:
        h = jnp.maximum(linear(h, w, b), 0.0)
    encoded = linear(h, *enc_params[-1])
    mu = encoded
    logvar = encoded
    z = mu + eps * jnp.exp(0.5 * logvar)
    d = z
    for w, b in dec_params[:-1]:
        d = jnp.maximum(linear(d, w, b), 0.0)
    d = linear(d, *dec_params[-1])
    return mu, logvar, jax.nn.sigmoid(d)


if __name__ == "__main__":
    # Module defaults: i = o = 28*28 = 784, n_features = 3; small batch = 2.
    B, I, NF, O = 2, 28 * 28, 3, 28 * 28

    root = jax.random.PRNGKey(0)
    k_param, k_x, k_eps, k_x2, k_eps2, k_x3, k_eps3 = jax.random.split(root, 7)

    enc_params, dec_params = make_params(k_param, I, NF, O)

    # --- spec-consistent small shape (batch = 2) ---
    # TODO(synk): torch.randn_like(std) inside reparameterize has no in-kernel
    # equivalent here; eps is supplied as an explicit deterministic input.
    x = jax.random.uniform(k_x, (B, I), jnp.float32)        # "image" input
    eps = jax.random.normal(k_eps, (B, NF), jnp.float32)    # randn_like(std)

    mu, logvar, decoded = ae_forward(x, eps, enc_params, dec_params)
    jax.block_until_ready((mu, logvar, decoded))

    mu_r, logvar_r, dec_r = ae_reference(x, eps, enc_params, dec_params)
    assert mu.shape == (B, NF) and logvar.shape == (B, NF)
    assert decoded.shape == (B, O)
    assert jnp.allclose(mu, mu_r, atol=1e-3, rtol=1e-3)
    assert jnp.allclose(logvar, logvar_r, atol=1e-3, rtol=1e-3)
    assert jnp.allclose(decoded, dec_r, atol=1e-3, rtol=1e-3)

    # --- multi-tile grid + ragged batch (pad/slice path) ---
    B2 = 500
    x2 = jax.random.uniform(k_x2, (B2, I), jnp.float32)
    eps2 = jax.random.normal(k_eps2, (B2, NF), jnp.float32)
    mu2, _, dec2 = ae_forward(x2, eps2, enc_params, dec_params)
    jax.block_until_ready((mu2, dec2))
    mu2_r, _, dec2_r = ae_reference(x2, eps2, enc_params, dec_params)
    assert mu2.shape == (B2, NF) and dec2.shape == (B2, O)
    assert jnp.allclose(mu2, mu2_r, atol=1e-3, rtol=1e-3)
    assert jnp.allclose(dec2, dec2_r, atol=1e-3, rtol=1e-3)

    # --- tile-aligned batch (no wrapper-side pad/slice of x/decoded) ---
    B3 = 512
    x3 = jax.random.uniform(k_x3, (B3, I), jnp.float32)
    eps3 = jax.random.normal(k_eps3, (B3, NF), jnp.float32)
    mu3, _, dec3 = ae_forward(x3, eps3, enc_params, dec_params)
    jax.block_until_ready((mu3, dec3))
    mu3_r, _, dec3_r = ae_reference(x3, eps3, enc_params, dec_params)
    assert jnp.allclose(mu3, mu3_r, atol=1e-3, rtol=1e-3)
    assert jnp.allclose(dec3, dec3_r, atol=1e-3, rtol=1e-3)

    print("KERNEL_OK")
</pallas_src>

<mosaic_0001>
module attributes {stable_mosaic.version = 11 : i64} {
  func.func @ae_kernel(%arg0: i32, %arg1: memref<8x784xbf16, #tpu.memory_space<vmem>>, %arg2: memref<8x8xf32, #tpu.memory_space<vmem>>, %arg3: memref<784x128xbf16, #tpu.memory_space<vmem>>, %arg4: memref<1x128xf32, #tpu.memory_space<vmem>>, %arg5: memref<128x64xbf16, #tpu.memory_space<vmem>>, %arg6: memref<1x64xf32, #tpu.memory_space<vmem>>, %arg7: memref<64x32xbf16, #tpu.memory_space<vmem>>, %arg8: memref<1x32xf32, #tpu.memory_space<vmem>>, %arg9: memref<32x16xbf16, #tpu.memory_space<vmem>>, %arg10: memref<1x16xf32, #tpu.memory_space<vmem>>, %arg11: memref<16x8xbf16, #tpu.memory_space<vmem>>, %arg12: memref<1x8xf32, #tpu.memory_space<vmem>>, %arg13: memref<8x16xbf16, #tpu.memory_space<vmem>>, %arg14: memref<1x16xf32, #tpu.memory_space<vmem>>, %arg15: memref<16x32xbf16, #tpu.memory_space<vmem>>, %arg16: memref<1x32xf32, #tpu.memory_space<vmem>>, %arg17: memref<32x64xbf16, #tpu.memory_space<vmem>>, %arg18: memref<1x64xf32, #tpu.memory_space<vmem>>, %arg19: memref<64x128xbf16, #tpu.memory_space<vmem>>, %arg20: memref<1x128xf32, #tpu.memory_space<vmem>>, %arg21: memref<128x784xbf16, #tpu.memory_space<vmem>>, %arg22: memref<1x784xf32, #tpu.memory_space<vmem>>, %arg23: memref<8x8xf32, #tpu.memory_space<vmem>>, %arg24: memref<8x784xf32, #tpu.memory_space<vmem>>) attributes {dimension_semantics = [#tpu.dimension_semantics<parallel>], iteration_bounds = array<i64: 1>, scalar_prefetch = 0 : i64, scratch_operands = 0 : i64, tpu.core_type = #tpu.core_type<tc>, window_params = [{transform_indices = @transform_0, window_bounds = array<i64: 8, 784>}, {transform_indices = @transform_1, window_bounds = array<i64: 8, 8>}, {pipeline_mode = #tpu.pipeline_mode<synchronous>, transform_indices = @transform_2, window_bounds = array<i64: 784, 128>}, {pipeline_mode = #tpu.pipeline_mode<synchronous>, transform_indices = @transform_3, window_bounds = array<i64: 1, 128>}, {pipeline_mode = #tpu.pipeline_mode<synchronous>, transform_indices = @transform_4, window_bounds = array<i64: 128, 64>}, {pipeline_mode = #tpu.pipeline_mode<synchronous>, transform_indices = @transform_5, window_bounds = array<i64: 1, 64>}, {pipeline_mode = #tpu.pipeline_mode<synchronous>, transform_indices = @transform_6, window_bounds = array<i64: 64, 32>}, {pipeline_mode = #tpu.pipeline_mode<synchronous>, transform_indices = @transform_7, window_bounds = array<i64: 1, 32>}, {pipeline_mode = #tpu.pipeline_mode<synchronous>, transform_indices = @transform_8, window_bounds = array<i64: 32, 16>}, {pipeline_mode = #tpu.pipeline_mode<synchronous>, transform_indices = @transform_9, window_bounds = array<i64: 1, 16>}, {pipeline_mode = #tpu.pipeline_mode<synchronous>, transform_indices = @transform_10, window_bounds = array<i64: 16, 8>}, {pipeline_mode = #tpu.pipeline_mode<synchronous>, transform_indices = @transform_11, window_bounds = array<i64: 1, 8>}, {pipeline_mode = #tpu.pipeline_mode<synchronous>, transform_indices = @transform_12, window_bounds = array<i64: 8, 16>}, {pipeline_mode = #tpu.pipeline_mode<synchronous>, transform_indices = @transform_13, window_bounds = array<i64: 1, 16>}, {pipeline_mode = #tpu.pipeline_mode<synchronous>, transform_indices = @transform_14, window_bounds = array<i64: 16, 32>}, {pipeline_mode = #tpu.pipeline_mode<synchronous>, transform_indices = @transform_15, window_bounds = array<i64: 1, 32>}, {pipeline_mode = #tpu.pipeline_mode<synchronous>, transform_indices = @transform_16, window_bounds = array<i64: 32, 64>}, {pipeline_mode = #tpu.pipeline_mode<synchronous>, transform_indices = @transform_17, window_bounds = array<i64: 1, 64>}, {pipeline_mode = #tpu.pipeline_mode<synchronous>, transform_indices = @transform_18, window_bounds = array<i64: 64, 128>}, {pipeline_mode = #tpu.pipeline_mode<synchronous>, transform_indices = @transform_19, window_bounds = array<i64: 1, 128>}, {pipeline_mode = #tpu.pipeline_mode<synchronous>, transform_indices = @transform_20, window_bounds = array<i64: 128, 784>}, {pipeline_mode = #tpu.pipeline_mode<synchronous>, transform_indices = @transform_21, window_bounds = array<i64: 1, 784>}, {transform_indices = @transform_22, window_bounds = array<i64: 8, 8>}, {transform_indices = @transform_23, window_bounds = array<i64: 8, 784>}]} {
    %c0 = arith.constant 0 : index
    %c0_0 = arith.constant 0 : index
    %0 = vector.load %arg1[%c0, %c0_0] : memref<8x784xbf16, #tpu.memory_space<vmem>>, vector<8x784xbf16>
    %c0_1 = arith.constant 0 : index
    %c0_2 = arith.constant 0 : index
    %1 = vector.load %arg3[%c0_1, %c0_2] : memref<784x128xbf16, #tpu.memory_space<vmem>>, vector<784x128xbf16>
    %cst = arith.constant dense<0.000000e+00> : vector<8x128xf32>
    %2 = tpu.matmul %0, %1, %cst {dimension_numbers = #tpu.dot_dimension_numbers<[1], [0], [0], [1], [0, 0, 1, 1], [], []>} : vector<8x784xbf16>, vector<784x128xbf16>, vector<8x128xf32> -> vector<8x128xf32>
    %c0_3 = arith.constant 0 : index
    %c0_4 = arith.constant 0 : index
    %3 = vector.load %arg4[%c0_3, %c0_4] : memref<1x128xf32, #tpu.memory_space<vmem>>, vector<1x128xf32>
    %4 = vector.broadcast %3 : vector<1x128xf32> to vector<8x128xf32>
    %5 = arith.addf %2, %4 : vector<8x128xf32>
    %cst_5 = arith.constant 0.000000e+00 : f32
    %6 = vector.broadcast %cst_5 : f32 to vector<8x128xf32>
    %7 = arith.maximumf %5, %6 : vector<8x128xf32>
    %c0_6 = arith.constant 0 : index
    %c0_7 = arith.constant 0 : index
    %8 = vector.load %arg5[%c0_6, %c0_7] : memref<128x64xbf16, #tpu.memory_space<vmem>>, vector<128x64xbf16>
    %9 = arith.truncf %7 : vector<8x128xf32> to vector<8x128xbf16>
    %cst_8 = arith.constant dense<0.000000e+00> : vector<8x64xf32>
    %10 = tpu.matmul %9, %8, %cst_8 {dimension_numbers = #tpu.dot_dimension_numbers<[1], [0], [0], [1], [0, 0, 1, 1], [], []>} : vector<8x128xbf16>, vector<128x64xbf16>, vector<8x64xf32> -> vector<8x64xf32>
    %c0_9 = arith.constant 0 : index
    %c0_10 = arith.constant 0 : index
    %11 = vector.load %arg6[%c0_9, %c0_10] : memref<1x64xf32, #tpu.memory_space<vmem>>, vector<1x64xf32>
    %12 = vector.broadcast %11 : vector<1x64xf32> to vector<8x64xf32>
    %13 = arith.addf %10, %12 : vector<8x64xf32>
    %cst_11 = arith.constant 0.000000e+00 : f32
    %14 = vector.broadcast %cst_11 : f32 to vector<8x64xf32>
    %15 = arith.maximumf %13, %14 : vector<8x64xf32>
    %c0_12 = arith.constant 0 : index
    %c0_13 = arith.constant 0 : index
    %16 = vector.load %arg7[%c0_12, %c0_13] : memref<64x32xbf16, #tpu.memory_space<vmem>>, vector<64x32xbf16>
    %17 = arith.truncf %15 : vector<8x64xf32> to vector<8x64xbf16>
    %cst_14 = arith.constant dense<0.000000e+00> : vector<8x32xf32>
    %18 = tpu.matmul %17, %16, %cst_14 {dimension_numbers = #tpu.dot_dimension_numbers<[1], [0], [0], [1], [0, 0, 1, 1], [], []>} : vector<8x64xbf16>, vector<64x32xbf16>, vector<8x32xf32> -> vector<8x32xf32>
    %c0_15 = arith.constant 0 : index
    %c0_16 = arith.constant 0 : index
    %19 = vector.load %arg8[%c0_15, %c0_16] : memref<1x32xf32, #tpu.memory_space<vmem>>, vector<1x32xf32>
    %20 = vector.broadcast %19 : vector<1x32xf32> to vector<8x32xf32>
    %21 = arith.addf %18, %20 : vector<8x32xf32>
    %cst_17 = arith.constant 0.000000e+00 : f32
    %22 = vector.broadcast %cst_17 : f32 to vector<8x32xf32>
    %23 = arith.maximumf %21, %22 : vector<8x32xf32>
    %c0_18 = arith.constant 0 : index
    %c0_19 = arith.constant 0 : index
    %24 = vector.load %arg9[%c0_18, %c0_19] : memref<32x16xbf16, #tpu.memory_space<vmem>>, vector<32x16xbf16>
    %25 = arith.truncf %23 : vector<8x32xf32> to vector<8x32xbf16>
    %cst_20 = arith.constant dense<0.000000e+00> : vector<8x16xf32>
    %26 = tpu.matmul %25, %24, %cst_20 {dimension_numbers = #tpu.dot_dimension_numbers<[1], [0], [0], [1], [0, 0, 1, 1], [], []>} : vector<8x32xbf16>, vector<32x16xbf16>, vector<8x16xf32> -> vector<8x16xf32>
    %c0_21 = arith.constant 0 : index
    %c0_22 = arith.constant 0 : index
    %27 = vector.load %arg10[%c0_21, %c0_22] : memref<1x16xf32, #tpu.memory_space<vmem>>, vector<1x16xf32>
    %28 = vector.broadcast %27 : vector<1x16xf32> to vector<8x16xf32>
    %29 = arith.addf %26, %28 : vector<8x16xf32>
    %cst_23 = arith.constant 0.000000e+00 : f32
    %30 = vector.broadcast %cst_23 : f32 to vector<8x16xf32>
    %31 = arith.maximumf %29, %30 : vector<8x16xf32>
    %c0_24 = arith.constant 0 : index
    %c0_25 = arith.constant 0 : index
    %32 = vector.load %arg11[%c0_24, %c0_25] : memref<16x8xbf16, #tpu.memory_space<vmem>>, vector<16x8xbf16>
    %33 = arith.truncf %31 : vector<8x16xf32> to vector<8x16xbf16>
    %cst_26 = arith.constant dense<0.000000e+00> : vector<8x8xf32>
    %34 = tpu.matmul %33, %32, %cst_26 {dimension_numbers = #tpu.dot_dimension_numbers<[1], [0], [0], [1], [0, 0, 1, 1], [], []>} : vector<8x16xbf16>, vector<16x8xbf16>, vector<8x8xf32> -> vector<8x8xf32>
    %c0_27 = arith.constant 0 : index
    %c0_28 = arith.constant 0 : index
    %35 = vector.load %arg12[%c0_27, %c0_28] : memref<1x8xf32, #tpu.memory_space<vmem>>, vector<1x8xf32>
    %36 = vector.broadcast %35 : vector<1x8xf32> to vector<8x8xf32>
    %37 = arith.addf %34, %36 : vector<8x8xf32>
    %c0_29 = arith.constant 0 : index
    %c0_30 = arith.constant 0 : index
    %38 = vector.load %arg23[%c0_29, %c0_30] : memref<8x8xf32, #tpu.memory_space<vmem>>, vector<8x8xf32>
    tpu.vector_store %arg23[%c0_29, %c0_30], %37 {strides = array<i32>} : memref<8x8xf32, #tpu.memory_space<vmem>>, vector<8x8xf32>,
    %cst_31 = arith.constant 5.000000e-01 : f32
    %39 = vector.broadcast %cst_31 : f32 to vector<8x8xf32>
    %40 = arith.mulf %39, %37 : vector<8x8xf32>
    %41 = math.exp %40 : vector<8x8xf32>
    %c0_32 = arith.constant 0 : index
    %c0_33 = arith.constant 0 : index
    %42 = vector.load %arg2[%c0_32, %c0_33] : memref<8x8xf32, #tpu.memory_space<vmem>>, vector<8x8xf32>
    %43 = arith.mulf %42, %41 : vector<8x8xf32>
    %44 = arith.addf %37, %43 : vector<8x8xf32>
    %c0_34 = arith.constant 0 : index
    %c0_35 = arith.constant 0 : index
    %45 = vector.load %arg13[%c0_34, %c0_35] : memref<8x16xbf16, #tpu.memory_space<vmem>>, vector<8x16xbf16>
    %46 = arith.truncf %44 : vector<8x8xf32> to vector<8x8xbf16>
    %cst_36 = arith.constant dense<0.000000e+00> : vector<8x16xf32>
    %47 = tpu.matmul %46, %45, %cst_36 {dimension_numbers = #tpu.dot_dimension_numbers<[1], [0], [0], [1], [0, 0, 1, 1], [], []>} : vector<8x8xbf16>, vector<8x16xbf16>, vector<8x16xf32> -> vector<8x16xf32>
    %c0_37 = arith.constant 0 : index
    %c0_38 = arith.constant 0 : index
    %48 = vector.load %arg14[%c0_37, %c0_38] : memref<1x16xf32, #tpu.memory_space<vmem>>, vector<1x16xf32>
    %49 = vector.broadcast %48 : vector<1x16xf32> to vector<8x16xf32>
    %50 = arith.addf %47, %49 : vector<8x16xf32>
    %cst_39 = arith.constant 0.000000e+00 : f32
    %51 = vector.broadcast %cst_39 : f32 to vector<8x16xf32>
    %52 = arith.maximumf %50, %51 : vector<8x16xf32>
    %c0_40 = arith.constant 0 : index
    %c0_41 = arith.constant 0 : index
    %53 = vector.load %arg15[%c0_40, %c0_41] : memref<16x32xbf16, #tpu.memory_space<vmem>>, vector<16x32xbf16>
    %54 = arith.truncf %52 : vector<8x16xf32> to vector<8x16xbf16>
    %cst_42 = arith.constant dense<0.000000e+00> : vector<8x32xf32>
    %55 = tpu.matmul %54, %53, %cst_42 {dimension_numbers = #tpu.dot_dimension_numbers<[1], [0], [0], [1], [0, 0, 1, 1], [], []>} : vector<8x16xbf16>, vector<16x32xbf16>, vector<8x32xf32> -> vector<8x32xf32>
    %c0_43 = arith.constant 0 : index
    %c0_44 = arith.constant 0 : index
    %56 = vector.load %arg16[%c0_43, %c0_44] : memref<1x32xf32, #tpu.memory_space<vmem>>, vector<1x32xf32>
    %57 = vector.broadcast %56 : vector<1x32xf32> to vector<8x32xf32>
    %58 = arith.addf %55, %57 : vector<8x32xf32>
    %cst_45 = arith.constant 0.000000e+00 : f32
    %59 = vector.broadcast %cst_45 : f32 to vector<8x32xf32>
    %60 = arith.maximumf %58, %59 : vector<8x32xf32>
    %c0_46 = arith.constant 0 : index
    %c0_47 = arith.constant 0 : index
    %61 = vector.load %arg17[%c0_46, %c0_47] : memref<32x64xbf16, #tpu.memory_space<vmem>>, vector<32x64xbf16>
    %62 = arith.truncf %60 : vector<8x32xf32> to vector<8x32xbf16>
    %cst_48 = arith.constant dense<0.000000e+00> : vector<8x64xf32>
    %63 = tpu.matmul %62, %61, %cst_48 {dimension_numbers = #tpu.dot_dimension_numbers<[1], [0], [0], [1], [0, 0, 1, 1], [], []>} : vector<8x32xbf16>, vector<32x64xbf16>, vector<8x64xf32> -> vector<8x64xf32>
    %c0_49 = arith.constant 0 : index
    %c0_50 = arith.constant 0 : index
    %64 = vector.load %arg18[%c0_49, %c0_50] : memref<1x64xf32, #tpu.memory_space<vmem>>, vector<1x64xf32>
    %65 = vector.broadcast %64 : vector<1x64xf32> to vector<8x64xf32>
    %66 = arith.addf %63, %65 : vector<8x64xf32>
    %cst_51 = arith.constant 0.000000e+00 : f32
    %67 = vector.broadcast %cst_51 : f32 to vector<8x64xf32>
    %68 = arith.maximumf %66, %67 : vector<8x64xf32>
    %c0_52 = arith.constant 0 : index
    %c0_53 = arith.constant 0 : index
    %69 = vector.load %arg19[%c0_52, %c0_53] : memref<64x128xbf16, #tpu.memory_space<vmem>>, vector<64x128xbf16>
    %70 = arith.truncf %68 : vector<8x64xf32> to vector<8x64xbf16>
    %cst_54 = arith.constant dense<0.000000e+00> : vector<8x128xf32>
    %71 = tpu.matmul %70, %69, %cst_54 {dimension_numbers = #tpu.dot_dimension_numbers<[1], [0], [0], [1], [0, 0, 1, 1], [], []>} : vector<8x64xbf16>, vector<64x128xbf16>, vector<8x128xf32> -> vector<8x128xf32>
    %c0_55 = arith.constant 0 : index
    %c0_56 = arith.constant 0 : index
    %72 = vector.load %arg20[%c0_55, %c0_56] : memref<1x128xf32, #tpu.memory_space<vmem>>, vector<1x128xf32>
    %73 = vector.broadcast %72 : vector<1x128xf32> to vector<8x128xf32>
    %74 = arith.addf %71, %73 : vector<8x128xf32>
    %cst_57 = arith.constant 0.000000e+00 : f32
    %75 = vector.broadcast %cst_57 : f32 to vector<8x128xf32>
    %76 = arith.maximumf %74, %75 : vector<8x128xf32>
    %c0_58 = arith.constant 0 : index
    %c0_59 = arith.constant 0 : index
    %77 = vector.load %arg21[%c0_58, %c0_59] : memref<128x784xbf16, #tpu.memory_space<vmem>>, vector<128x784xbf16>
    %78 = arith.truncf %76 : vector<8x128xf32> to vector<8x128xbf16>
    %cst_60 = arith.constant dense<0.000000e+00> : vector<8x784xf32>
    %79 = tpu.matmul %78, %77, %cst_60 {dimension_numbers = #tpu.dot_dimension_numbers<[1], [0], [0], [1], [0, 0, 1, 1], [], []>} : vector<8x128xbf16>, vector<128x784xbf16>, vector<8x784xf32> -> vector<8x784xf32>
    %c0_61 = arith.constant 0 : index
    %c0_62 = arith.constant 0 : index
    %80 = vector.load %arg22[%c0_61, %c0_62] : memref<1x784xf32, #tpu.memory_space<vmem>>, vector<1x784xf32>
    %81 = vector.broadcast %80 : vector<1x784xf32> to vector<8x784xf32>
    %82 = arith.addf %79, %81 : vector<8x784xf32>
    %83 = arith.negf %82 : vector<8x784xf32>
    %84 = math.exp %83 : vector<8x784xf32>
    %cst_63 = arith.constant 1.000000e+00 : f32
    %85 = vector.broadcast %cst_63 : f32 to vector<8x784xf32>
    %86 = arith.addf %85, %84 : vector<8x784xf32>
    %87 = arith.divf %85, %86 : vector<8x784xf32>
    %c0_64 = arith.constant 0 : index
    %c0_65 = arith.constant 0 : index
    %88 = vector.load %arg24[%c0_64, %c0_65] : memref<8x784xf32, #tpu.memory_space<vmem>>, vector<8x784xf32>
    tpu.vector_store %arg24[%c0_64, %c0_65], %87 {strides = array<i32>} : memref<8x784xf32, #tpu.memory_space<vmem>>, vector<8x784xf32>,
    return
  }
  func.func @transform_0(%arg0: i32) -> (i32, i32) {
    %c0_i32 = arith.constant 0 : i32
    %c0_i32_0 = arith.constant 0 : i32
    return %arg0, %c0_i32 : i32, i32
  }
  func.func @transform_1(%arg0: i32) -> (i32, i32) {
    %c0_i32 = arith.constant 0 : i32
    %c0_i32_0 = arith.constant 0 : i32
    return %arg0, %c0_i32 : i32, i32
  }
  func.func @transform_2(%arg0: i32) -> (i32, i32) {
    %c0_i32 = arith.constant 0 : i32
    %c0_i32_0 = arith.constant 0 : i32
    %c0_i32_1 = arith.constant 0 : i32
    return %c0_i32, %c0_i32_0 : i32, i32
  }
  func.func @transform_3(%arg0: i32) -> (i32, i32) {
    %c0_i32 = arith.constant 0 : i32
    %c0_i32_0 = arith.constant 0 : i32
    %c0_i32_1 = arith.constant 0 : i32
    return %c0_i32, %c0_i32_0 : i32, i32
  }
  func.func @transform_4(%arg0: i32) -> (i32, i32) {
    %c0_i32 = arith.constant 0 : i32
    %c0_i32_0 = arith.constant 0 : i32
    %c0_i32_1 = arith.constant 0 : i32
    return %c0_i32, %c0_i32_0 : i32, i32
  }
  func.func @transform_5(%arg0: i32) -> (i32, i32) {
    %c0_i32 = arith.constant 0 : i32
    %c0_i32_0 = arith.constant 0 : i32
    %c0_i32_1 = arith.constant 0 : i32
    return %c0_i32, %c0_i32_0 : i32, i32
  }
  func.func @transform_6(%arg0: i32) -> (i32, i32) {
    %c0_i32 = arith.constant 0 : i32
    %c0_i32_0 = arith.constant 0 : i32
    %c0_i32_1 = arith.constant 0 : i32
    return %c0_i32, %c0_i32_0 : i32, i32
  }
  func.func @transform_7(%arg0: i32) -> (i32, i32) {
    %c0_i32 = arith.constant 0 : i32
    %c0_i32_0 = arith.constant 0 : i32
    %c0_i32_1 = arith.constant 0 : i32
    return %c0_i32, %c0_i32_0 : i32, i32
  }
  func.func @transform_8(%arg0: i32) -> (i32, i32) {
    %c0_i32 = arith.constant 0 : i32
    %c0_i32_0 = arith.constant 0 : i32
    %c0_i32_1 = arith.constant 0 : i32
    return %c0_i32, %c0_i32_0 : i32, i32
  }
  func.func @transform_9(%arg0: i32) -> (i32, i32) {
    %c0_i32 = arith.constant 0 : i32
    %c0_i32_0 = arith.constant 0 : i32
    %c0_i32_1 = arith.constant 0 : i32
    return %c0_i32, %c0_i32_0 : i32, i32
  }
  func.func @transform_10(%arg0: i32) -> (i32, i32) {
    %c0_i32 = arith.constant 0 : i32
    %c0_i32_0 = arith.constant 0 : i32
    %c0_i32_1 = arith.constant 0 : i32
    return %c0_i32, %c0_i32_0 : i32, i32
  }
  func.func @transform_11(%arg0: i32) -> (i32, i32) {
    %c0_i32 = arith.constant 0 : i32
    %c0_i32_0 = arith.constant 0 : i32
    %c0_i32_1 = arith.constant 0 : i32
    return %c0_i32, %c0_i32_0 : i32, i32
  }
  func.func @transform_12(%arg0: i32) -> (i32, i32) {
    %c0_i32 = arith.constant 0 : i32
    %c0_i32_0 = arith.constant 0 : i32
    %c0_i32_1 = arith.constant 0 : i32
    return %c0_i32, %c0_i32_0 : i32, i32
  }
  func.func @transform_13(%arg0: i32) -> (i32, i32) {
    %c0_i32 = arith.constant 0 : i32
    %c0_i32_0 = arith.constant 0 : i32
    %c0_i32_1 = arith.constant 0 : i32
    return %c0_i32, %c0_i32_0 : i32, i32
  }
  func.func @transform_14(%arg0: i32) -> (i32, i32) {
    %c0_i32 = arith.constant 0 : i32
    %c0_i32_0 = arith.constant 0 : i32
    %c0_i32_1 = arith.constant 0 : i32
    return %c0_i32, %c0_i32_0 : i32, i32
  }
  func.func @transform_15(%arg0: i32) -> (i32, i32) {
    %c0_i32 = arith.constant 0 : i32
    %c0_i32_0 = arith.constant 0 : i32
    %c0_i32_1 = arith.constant 0 : i32
    return %c0_i32, %c0_i32_0 : i32, i32
  }
  func.func @transform_16(%arg0: i32) -> (i32, i32) {
    %c0_i32 = arith.constant 0 : i32
    %c0_i32_0 = arith.constant 0 : i32
    %c0_i32_1 = arith.constant 0 : i32
    return %c0_i32, %c0_i32_0 : i32, i32
  }
  func.func @transform_17(%arg0: i32) -> (i32, i32) {
    %c0_i32 = arith.constant 0 : i32
    %c0_i32_0 = arith.constant 0 : i32
    %c0_i32_1 = arith.constant 0 : i32
    return %c0_i32, %c0_i32_0 : i32, i32
  }
  func.func @transform_18(%arg0: i32) -> (i32, i32) {
    %c0_i32 = arith.constant 0 : i32
    %c0_i32_0 = arith.constant 0 : i32
    %c0_i32_1 = arith.constant 0 : i32
    return %c0_i32, %c0_i32_0 : i32, i32
  }
  func.func @transform_19(%arg0: i32) -> (i32, i32) {
    %c0_i32 = arith.constant 0 : i32
    %c0_i32_0 = arith.constant 0 : i32
    %c0_i32_1 = arith.constant 0 : i32
    return %c0_i32, %c0_i32_0 : i32, i32
  }
  func.func @transform_20(%arg0: i32) -> (i32, i32) {
    %c0_i32 = arith.constant 0 : i32
    %c0_i32_0 = arith.constant 0 : i32
    %c0_i32_1 = arith.constant 0 : i32
    return %c0_i32, %c0_i32_0 : i32, i32
  }
  func.func @transform_21(%arg0: i32) -> (i32, i32) {
    %c0_i32 = arith.constant 0 : i32
    %c0_i32_0 = arith.constant 0 : i32
    %c0_i32_1 = arith.constant 0 : i32
    return %c0_i32, %c0_i32_0 : i32, i32
  }
  func.func @transform_22(%arg0: i32) -> (i32, i32) {
    %c0_i32 = arith.constant 0 : i32
    %c0_i32_0 = arith.constant 0 : i32
    return %arg0, %c0_i32 : i32, i32
  }
  func.func @transform_23(%arg0: i32) -> (i32, i32) {
    %c0_i32 = arith.constant 0 : i32
    %c0_i32_0 = arith.constant 0 : i32
    return %arg0, %c0_i32 : i32, i32
  }
}

</mosaic_0001>

<bundles_post_ra>
// kernel: ae_forward.1
= control target key start
LH: loop header
LB: loop body
LE: loop exit
PB: predicated region body
PF: predicated region fallthrough
CT: control target
= control target key end

     0   :  { %v2440_v41 = vmov 0.0   ;;  %vm2441_vm0 = vmmov 0   ;;  %vm501_vm1 = vcmask 130048   ;;  %vm819_vm2 = vcmask 523264   ;;  %s3076_s2 = inlined_call_operand.vmem [shape: bf16[784,128], index: 2, kind: input, shape index: {}]   ;;  %s3077_s0 = inlined_call_operand.vmem [shape: bf16[8,784], index: 0, kind: input, shape index: {}]   ;;  %s3078_s4 = inlined_call_operand.vmem [shape: bf16[128,64], index: 4, kind: input, shape index: {}]   ;;  %s3079_s6 = inlined_call_operand.vmem [shape: bf16[64,32], index: 6, kind: input, shape index: {}]   ;;  %s3080_s3 = inlined_call_operand.vmem [shape: f32[1,128], index: 3, kind: input, shape index: {}]   ;;  %s3081_s8 = inlined_call_operand.vmem [shape: bf16[32,16], index: 8, kind: input, shape index: {}]   ;;  %s3082_s5 = inlined_call_operand.vmem [shape: f32[1,64], index: 5, kind: input, shape index: {}]   ;;  %s3083_s10 = inlined_call_operand.vmem [shape: bf16[16,8], index: 10, kind: input, shape index: {}]   ;;  %s3084_s7 = inlined_call_operand.vmem [shape: f32[1,32], index: 7, kind: input, shape index: {}]   ;;  %s3085_s9 = inlined_call_operand.vmem [shape: f32[1,16], index: 9, kind: input, shape index: {}]   ;;  %s3086_s12 = inlined_call_operand.vmem [shape: bf16[8,16], index: 12, kind: input, shape index: {}]   ;;  %s3087_s14 = inlined_call_operand.vmem [shape: bf16[16,32], index: 14, kind: input, shape index: {}]   ;;  %s3088_s11 = inlined_call_operand.vmem [shape: f32[1,8], index: 11, kind: input, shape index: {}]   ;;  %s3089_s22 = inlined_call_operand.vmem [shape: f32[8,8], index: 22, kind: output, shape index: {0}]   ;;  %s3090_s1 = inlined_call_operand.vmem [shape: f32[8,8], index: 1, kind: input, shape index: {}]   ;;  %s3091_s16 = inlined_call_operand.vmem [shape: bf16[32,64], index: 16, kind: input, shape index: {}]   ;;  %s3092_s13 = inlined_call_operand.vmem [shape: f32[1,16], index: 13, kind: input, shape index: {}]   ;;  %s3093_s18 = inlined_call_operand.vmem [shape: bf16[64,128], index: 18, kind: input, shape index: {}]   ;;  %s3094_s15 = inlined_call_operand.vmem [shape: f32[1,32], index: 15, kind: input, shape index: {}]   ;;  %s3095_s20 = inlined_call_operand.vmem [shape: bf16[128,784], index: 20, kind: input, shape index: {}]   ;;  %s3096_s17 = inlined_call_operand.vmem [shape: f32[1,64], index: 17, kind: input, shape index: {}]   ;;  %s3097_s19 = inlined_call_operand.vmem [shape: f32[1,128], index: 19, kind: input, shape index: {}]   ;;  %s3098_s21 = inlined_call_operand.vmem [shape: f32[1,784], index: 21, kind: input, shape index: {}]   ;;  %s3099_s23 = inlined_call_operand.vmem [shape: f32[8,784], index: 23, kind: output, shape index: {1}]  }
   0x1   :  { %3105 = sst [smem:[#allocation2_spill]] %s3076_s2  ;;  %vm888_vm3 = vcmask 261120   ;;  %vm1012_vm4 = vcmask 1043456   ;;  %vm992_vm5 = vcmask 64512  }
   0x2   :  { %3106 = sst [smem:[#allocation3_spill]] %s3077_s0  ;;  %s3113_s24 = sld [smem:[#allocation2_spill]] }
   0x3   :  { %3107 = sst [smem:[#allocation4_spill]] %s3078_s4  ;;  %s3114_s27 = sld [smem:[#allocation3_spill]] }
   0x4   :  { %3108 = sst [smem:[#allocation5_spill]] %s3079_s6  ;;  %s3115_s2 = sld [smem:[#allocation4_spill]] }
   0x5   :  { %3109 = sst [smem:[#allocation6_spill]] %s3080_s3 }
   0x6   :  { %3110 = sst [smem:[#allocation7_spill]] %s3081_s8 }
   0x7   :  { %3111 = sst [smem:[#allocation8_spill]] %s3082_s5  ;;  %s3118_s6 = sld [smem:[#allocation7_spill]] }
   0x8   :  { %3112 = sst [smem:[#allocation9_spill]] %s3083_s10  ;;  %v2252_v0 = vld [vmem:[%s3113_s24 + $0x40] sm:$0xff]   ;;  %v2256_v4 = vld [vmem:[%s3113_s24 + $0x48] sm:$0xff]   ;;  %v2260_v8 = vld [vmem:[%s3113_s24 + $0x50] sm:$0xff]   ;;  %s3119_s25 = sld [smem:[#allocation8_spill]] }
   0x9   :  { %v2253_v1 = vld [vmem:[%s3113_s24] sm:$0xff]   ;;  %2037 = vmatprep.subr.bf16.mxu0 %v2252_v0  ;;  %v2257_v5 = vld [vmem:[%s3113_s24 + $0x8] sm:$0xff]   ;;  %v2261_v9 = vld [vmem:[%s3113_s24 + $0x10] sm:$0xff]   ;;  %s3120_s4 = sld [smem:[#allocation9_spill]] }
   0xa   :  { %v2254_v2 = vld [vmem:[%s3113_s24 + $0xc0] sm:$0xff]   ;;  %2038 = vmatpush3.bf16.msra.mxu0 %v2253_v1  ;;  %v2258_v6 = vld [vmem:[%s3113_s24 + $0xc8] sm:$0xff]   ;;  %v2262_v10 = vld [vmem:[%s3113_s24 + $0xd0] sm:$0xff]  }
   0xb   :  { %v2255_v3 = vld [vmem:[%s3113_s24 + $0x80] sm:$0xff]   ;;  %2059 = vmatprep.subr.bf16.mxu1 %v2254_v2  ;;  %2039 = vmatprep.subr.bf16.mxu0 %v2256_v4  ;;  %v2259_v7 = vld [vmem:[%s3113_s24 + $0x88] sm:$0xff]   ;;  %v2263_v11 = vld [vmem:[%s3113_s24 + $0x90] sm:$0xff]  }
   0xc   :  { %2060 = vmatpush3.bf16.msra.mxu1 %v2255_v3  ;;  %v2264_v12 = vld [vmem:[%s3113_s24 + $0x58] sm:$0xff]   ;;  %v2268_v16 = vld [vmem:[%s3113_s24 + $0x60] sm:$0xff]   ;;  %v2272_v20 = vld [vmem:[%s3113_s24 + $0x68] sm:$0xff]  }
   0xd   :  { %2061 = vmatprep.subr.bf16.mxu1 %v2258_v6  ;;  %v2265_v13 = vld [vmem:[%s3113_s24 + $0x18] sm:$0xff]   ;;  %v2269_v17 = vld [vmem:[%s3113_s24 + $0x20] sm:$0xff]   ;;  %v2273_v21 = vld [vmem:[%s3113_s24 + $0x28] sm:$0xff]  }
   0xe   :  { %2040 = vmatpush3.bf16.msra.mxu0 %v2257_v5  ;;  %v2266_v14 = vld [vmem:[%s3113_s24 + $0xd8] sm:$0xff]   ;;  %v2270_v18 = vld [vmem:[%s3113_s24 + $0xe0] sm:$0xff]   ;;  %v2274_v22 = vld [vmem:[%s3113_s24 + $0xe8] sm:$0xff]  }
   0xf   :  { %2041 = vmatprep.subr.bf16.mxu0 %v2260_v8  ;;  %v2267_v15 = vld [vmem:[%s3113_s24 + $0x98] sm:$0xff]   ;;  %v2271_v19 = vld [vmem:[%s3113_s24 + $0xa0] sm:$0xff]   ;;  %v2275_v23 = vld [vmem:[%s3113_s24 + $0xa8] sm:$0xff]  }
  0x10   :  { %2062 = vmatpush3.bf16.msra.mxu1 %v2259_v7  ;;  %v2276_v24 = vld [vmem:[%s3113_s24 + $0x70] sm:$0xff]   ;;  %v2280_v28 = vld [vmem:[%s3113_s24 + $0x78] sm:$0xff]   ;;  %v74_v31 = vld [vmem:[%s3114_s27] sm:$0xff] }
  0x11   :  { %2063 = vmatprep.subr.bf16.mxu1 %v2262_v10  ;;  %v2277_v25 = vld [vmem:[%s3113_s24 + $0x30] sm:$0xff]   ;;  %v2281_v29 = vld [vmem:[%s3113_s24 + $0x38] sm:$0xff]   ;;  %v1880_v32 = vcombine.low %v74_v31, %v74_v31  ;;  %v1881_v33 = vcombine.high %v74_v31, %v74_v31  ;;  %v2287_v35 = vld [vmem:[%s3113_s24 + $0x140] sm:$0xff]  }
  0x12   :  { %2042 = vmatpush3.bf16.msra.mxu0 %v2261_v9  ;;  %v2278_v26 = vld [vmem:[%s3113_s24 + $0xf0] sm:$0xff]   ;;  %v2282_v30 = vld [vmem:[%s3113_s24 + $0xf8] sm:$0xff]   ;;  %v75_v36 = vld [vmem:[%s3114_s27 + $0x8] sm:$0xff] }
  0x13   :  { %2043 = vmatprep.subr.bf16.mxu0 %v2264_v12  ;;  %v2279_v27 = vld [vmem:[%s3113_s24 + $0xb0] sm:$0xff]   ;;  %v2286_v34 = vld [vmem:[%s3113_s24 + $0xb8] sm:$0xff]   ;;  %537 = vmatprep.mubr.bf16.mxu0 %v1881_v33  ;;  %v1882_v37 = vcombine.low %v75_v36, %v75_v36  ;;  %v1883_v38 = vcombine.high %v75_v36, %v75_v36  ;;  %v2290_v39 = vld [vmem:[%s3113_s24 + $0x100] sm:$0xff]  }
  0x14   :  { %2064 = vmatpush3.bf16.msra.mxu1 %v2263_v11  ;;  %v2291_v40 = vld [vmem:[%s3113_s24 + $0x148] sm:$0xff]   ;;  %v2293_v43 = vld [vmem:[%s3113_s24 + $0x150] sm:$0xff]   ;;  %v2295_v45 = vld [vmem:[%s3113_s24 + $0x158] sm:$0xff]  }
  0x15   :  { %2065 = vmatprep.subr.bf16.mxu1 %v2266_v14  ;;  %577 = vmatprep.mubr.bf16.mxu1 %v1883_v38  ;;  %v2292_v42 = vld [vmem:[%s3113_s24 + $0x108] sm:$0xff]   ;;  %v2294_v44 = vld [vmem:[%s3113_s24 + $0x110] sm:$0xff]   ;;  %v2296_v46 = vld [vmem:[%s3113_s24 + $0x118] sm:$0xff]  }
  0x16   :  { %2044 = vmatpush3.bf16.msra.mxu0 %v2265_v13  ;;  %v2297_v47 = vld [vmem:[%s3113_s24 + $0x160] sm:$0xff]   ;;  %v2299_v49 = vld [vmem:[%s3113_s24 + $0x168] sm:$0xff]   ;;  %v76_v51 = vld [vmem:[%s3114_s27 + $0x10] sm:$0xff] }
  0x17   :  { %2045 = vmatprep.subr.bf16.mxu0 %v2268_v16  ;;  %v2298_v48 = vld [vmem:[%s3113_s24 + $0x120] sm:$0xff]   ;;  %v2285_v52 = vld [vmem:[%s3114_s27 + $0x18] ss:$0 sps:$4 sm:$0xff]   ;;  %v1885_v53 = vcombine.high %v76_v51, %v76_v51  ;;  %v2300_v54 = vld [vmem:[%s3113_s24 + $0x128] sm:$0xff]   ;;  %v1884_v59 = vcombine.low %v76_v51, %v76_v51  ;;  %s3117_s27 = sld [smem:[#allocation6_spill]] }
  0x18   :  { %2066 = vmatpush3.bf16.msra.mxu1 %v2267_v15  ;;  %v2305_v50 = vld [vmem:[%s3113_s24 + $0x180] sm:$0xff]   ;;  %v2301_v55 = vld [vmem:[%s3113_s24 + $0x170] sm:$0xff]   ;;  %v2303_v57 = vld [vmem:[%s3113_s24 + $0x178] sm:$0xff]  }
  0x19   :  { %2067 = vmatprep.subr.bf16.mxu1 %v2270_v18  ;;  %v2302_v56 = vld [vmem:[%s3113_s24 + $0x130] sm:$0xff]   ;;  %v2304_v58 = vld [vmem:[%s3113_s24 + $0x138] sm:$0xff]   ;;  %v2308_v60 = vld [vmem:[%s3115_s2] sm:$0xff]   ;;  %s3116_s24 = sld [smem:[#allocation5_spill]] }
  0x1a   :  { %2046 = vmatpush3.bf16.msra.mxu0 %v2269_v17  ;;  %v2309_v61 = vld [vmem:[%s3115_s2 + $0x8] sm:$0xff]   ;;  %v2310_v62 = vld [vmem:[%s3115_s2 + $0x10] sm:$0xff]   ;;  %v2311_v63 = vld [vmem:[%s3115_s2 + $0x18] sm:$0xff]  }
  0x1b   :  { %2047 = vmatprep.subr.bf16.mxu0 %v2272_v20  ;;  %v2312_v0 = vld [vmem:[%s3115_s2 + $0x20] sm:$0xff]   ;;  %v2313_v1 = vld [vmem:[%s3115_s2 + $0x28] sm:$0xff]   ;;  %v2314_v2 = vld [vmem:[%s3115_s2 + $0x30] sm:$0xff]  }
  0x1c   :  { %2068 = vmatpush3.bf16.msra.mxu1 %v2271_v19  ;;  %v2315_v3 = vld [vmem:[%s3115_s2 + $0x38] sm:$0xff]  }
  0x1d   :  { %2069 = vmatprep.subr.bf16.mxu1 %v2274_v22  ;;  %v1879_v7 = vld [vmem:[%s3117_s27] ss:$0 sm:$0xff] }
  0x1e   :  { %2048 = vmatpush3.bf16.msra.mxu0 %v2273_v21 }
  0x1f   :  { %2049 = vmatprep.subr.bf16.mxu0 %v2276_v24  ;;  %v2316_v4 = vld [vmem:[%s3116_s24] sm:$0xff]   ;;  %v2317_v5 = vld [vmem:[%s3116_s24 + $0x8] sm:$0xff]   ;;  %v2319_v33 = vld [vmem:[%s3116_s24 + $0x18] sm:$0xff]  }
  0x20   :  { %2070 = vmatpush3.bf16.msra.mxu1 %v2275_v23 }
  0x21   :  { %2071 = vmatprep.subr.bf16.mxu1 %v2278_v26 }
  0x22   :  { %2050 = vmatpush3.bf16.msra.mxu0 %v2277_v25 }
  0x23   :  { %2051 = vmatprep.subr.bf16.mxu0 %v2280_v28 }
  0x24   :  { %2072 = vmatpush3.bf16.msra.mxu1 %v2279_v27 }
  0x25   :  { %2073 = vmatprep.subr.bf16.mxu1 %v2282_v30 }
  0x26   :  { %2052 = vmatpush3.bf16.msra.mxu0 %v2281_v29 }
  0x27   :  { %2081 = vmatprep.subr.bf16.mxu0 %v2287_v35  ;;  %v1937_v35 = vld [vmem:[%s3119_s25] ss:$0 sm:$0xff] }
  0x28   :  { %2074 = vmatpush3.bf16.msra.mxu1 %v2286_v34  ;;  %v2320_v34 = vld [vmem:[%s3118_s6] sm:$0xff]  }
  0x29   :  { %538 = vmatmul.mubr.bf16.vlgmr.msra.gmra.mrb[0].mxu0 %v1880_v32  ;;  %2145 = vmatprep.subr.bf16.mxu1 %v2440_v41  ;;  %v2318_v32 = vld [vmem:[%s3116_s24 + $0x10] sm:$0xff]  }
  0x2a   :  { %2082 = vmatpush3.bf16.msra.mxu0 %v2290_v39  ;;  %617 = vmatprep.mubr.bf16.mxu0 %v1885_v53 }
  0x2b   :  { %578 = vmatmul.mubr.bf16.vlgmr.msra.gmra.mrb[0].mxu1 %v1882_v37  ;;  %2083 = vmatprep.subr.bf16.mxu0 %v2291_v40 }
  0x2c   :  { %2147 = vmatprep.mubr.msk.bf16.mxu1 %vm2441_vm0, %v2440_v41  ;;  %2146 = vmatpush3.bf16.msra.mxu1 %v2305_v50 }
  0x2d   :  { %2151 = vmatprep.subr.bf16.mxu1 %v2440_v41 }
  0x2e   :  { %2084 = vmatpush3.bf16.msra.mxu0 %v2292_v42 }
  0x2f   :  { %2085 = vmatprep.subr.bf16.mxu0 %v2293_v43 }
  0x32   :  { %2086 = vmatpush3.bf16.msra.mxu0 %v2294_v44  ;;  %v2321_v44 = vld [vmem:[%s3118_s6 + $0x8] sm:$0xff]  }
  0x33   :  { %2087 = vmatprep.subr.bf16.mxu0 %v2295_v45  ;;  %2148 = vmatmul.mubr.msk.bf16.vlgmr.msra.gmra.mrb[4].mxu1 %vm501_vm1, %v2285_v52  ;;  %v1946_v45 = vld [vmem:[%s3084_s7] ss:$0 sm:$0xff] }
  0x34   :  { %2167 = vmatprep.mubr.msk.bf16.mxu1 %vm2441_vm0, %v2440_v41  ;;  %2152 = vmatpush3.bf16.msra.mxu1 %v2308_v60  ;;  %v2322_v52 = vld [vmem:[%s3120_s4] sm:$0xff]  }
  0x35   :  { %2153 = vmatprep.subr.bf16.mxu1 %v2440_v41 }
  0x36   :  { %2088 = vmatpush3.bf16.msra.mxu0 %v2296_v46 }
  0x37   :  { %2089 = vmatprep.subr.bf16.mxu0 %v2297_v47 }
  0x38   :  { %2154 = vmatpush3.bf16.msra.mxu1 %v2309_v61 }
  0x39   :  { %2155 = vmatprep.subr.bf16.mxu1 %v2440_v41 }
  0x3a   :  { %2090 = vmatpush3.bf16.msra.mxu0 %v2298_v48 }
  0x3b   :  { %2091 = vmatprep.subr.bf16.mxu0 %v2299_v49 }
  0x3c   :  { %2156 = vmatpush3.bf16.msra.mxu1 %v2310_v62  ;;  %v1000_v62 = vld [vmem:[%s3086_s12] sm:$0xf] }
  0x3d   :  { %2157 = vmatprep.subr.bf16.mxu1 %v2440_v41 }
  0x3e   :  { %2092 = vmatpush3.bf16.msra.mxu0 %v2300_v54  ;;  %v1952_v54 = vld [vmem:[%s3085_s9] ss:$0 sm:$0xff] }
  0x3f   :  { %2093 = vmatprep.subr.bf16.mxu0 %v2301_v55 }
  0x40   :  { %2158 = vmatpush3.bf16.msra.mxu1 %v2311_v63  ;;  %v1014_v63 = vsel %vm1012_vm4, %v1000_v62, 0  ;;  %v2339_v62 = vld [vmem:[%s3095_s20 + $0x40] ss:$28 sps:$4 sm:$0xff]  }
  0x41   :  { %2159 = vmatprep.subr.bf16.mxu1 %v2440_v41 }
  0x42   :  { %2094 = vmatpush3.bf16.msra.mxu0 %v2302_v56 }
  0x43   :  { %2095 = vmatprep.subr.bf16.mxu0 %v2303_v57 }
  0x44   :  { %2160 = vmatpush3.bf16.msra.mxu1 %v2312_v0  ;;  %v2323_v0 = vld [vmem:[%s3087_s14] sm:$0xff]  }
  0x45   :  { %2161 = vmatprep.subr.bf16.mxu1 %v2440_v41 }
  0x46   :  { %2096 = vmatpush3.bf16.msra.mxu0 %v2304_v58 }
  0x47   :  { %2171 = vmatprep.subr.bf16.mxu0 %v2440_v41 }
  0x48   :  { %2162 = vmatpush3.bf16.msra.mxu1 %v2313_v1  ;;  %v1956_v1 = vld [vmem:[%s3088_s11] ss:$0 sm:$0xff] }
  0x49   :  { %618 = vmatmul.mubr.bf16.vlgmr.msra.gmra.mrb[4].mxu0 %v1884_v59  ;;  %2163 = vmatprep.subr.bf16.mxu1 %v2440_v41 }
  0x4a   :  { %2179 = vmatprep.mubr.msk.bf16.mxu0 %vm2441_vm0, %v2440_v41  ;;  %2172 = vmatpush3.bf16.msra.mxu0 %v2316_v4 }
  0x4b   :  { %2173 = vmatprep.subr.bf16.mxu0 %v2440_v41 }
  0x4c   :  { %2164 = vmatpush3.bf16.msra.mxu1 %v2314_v2 }
  0x4d   :  { %2165 = vmatprep.subr.bf16.mxu1 %v2440_v41 }
  0x4e   :  { %2174 = vmatpush3.bf16.msra.mxu0 %v2317_v5 }
  0x4f   :  { %2175 = vmatprep.subr.bf16.mxu0 %v2440_v41 }
  0x50   :  { %2166 = vmatpush3.bf16.msra.mxu1 %v2315_v3 }
  0x51   :  { %2183 = vmatprep.subr.bf16.mxu1 %v2440_v41 }
  0x52   :  { %2176 = vmatpush3.bf16.msra.mxu0 %v2318_v32 }
  0x53   :  { %2177 = vmatprep.subr.bf16.mxu0 %v2440_v41 }
  0x56   :  { %2178 = vmatpush3.bf16.msra.mxu0 %v2319_v33 }
  0x57   :  { %2203 = vmatprep.subr.bf16.mxu0 %v2440_v41 }
  0xfc   :  { %v2053_v6 = vpop.f32.mrb[0].mxu0 }
  0xfd   :  { %v2054_v8 = vpop.f32.mrb[1].mxu0 }
  0xfe   :  { %v2055_v9 = vadd.f32 %v2054_v8, %v2053_v6  ;;  %v2056_v10 = vpop.f32.mrb[2].mxu0  ;;  %v2075_v11 = vpop.f32.mrb[0].mxu1 }
  0xff   :  { %v2057_v12 = vpop.f32.mrb[3].mxu0  ;;  %v2076_v14 = vpop.f32.mrb[1].mxu1 }
 0x100   :  { %v540_v13 = vadd.f32 %v2055_v9, %v1879_v7  ;;  %v2077_v15 = vadd.f32 %v2076_v14, %v2075_v11  ;;  %v2078_v16 = vpop.f32.mrb[2].mxu1  ;;  %v997_v9 = vld [vmem:[%s3090_s1] sm:$0xff] }
 0x101   :  { %v2079_v17 = vpop.f32.mrb[3].mxu1  ;;  %v2324_v14 = vld [vmem:[%s3091_s16] sm:$0xff]  }
 0x102   :  { %v580_v18 = vadd.f32 %v2077_v15, %v540_v13  ;;  %v1959_v15 = vld [vmem:[%s3092_s13] ss:$0 sm:$0xff] }
 0x106   :  { %v659_v19 = vpop.f32.mrb[4].mxu1 }
 0x107   :  { %v2149_v20 = vpop.f32.mrb[5].mxu1 }
 0x108   :  { %v662_v21 = vpop.f32.mrb[6].mxu1 }
 0x109   :  { %v2150_v22 = vpop.f32.mrb[7].mxu1 }
 0x11c   :  { %v2097_v23 = vpop.f32.mrb[4].mxu0 }
 0x11d   :  { %v2098_v24 = vpop.f32.mrb[5].mxu0 }
 0x11e   :  { %v2099_v25 = vadd.f32 %v2098_v24, %v2097_v23  ;;  %v2100_v26 = vpop.f32.mrb[6].mxu0  ;;  %v2325_v23 = vld [vmem:[%s3091_s16 + $0x8] sm:$0xff]   ;;  %v2326_v24 = vld [vmem:[%s3093_s18] sm:$0xff]  }
 0x11f   :  { %v2101_v27 = vpop.f32.mrb[7].mxu0  ;;  %v1961_v26 = vld [vmem:[%s3094_s15] ss:$0 sm:$0xff] }
 0x120   :  { %v620_v28 = vadd.f32 %v2099_v25, %v580_v18  ;;  %v2327_v25 = vld [vmem:[%s3093_s18 + $0x8] sm:$0xff]  }
 0x122   :  { %v660_v29 = vadd.f32 %v659_v19, %v620_v28 }
 0x124   :  { %v665_v30 = vmax.f32 %v660_v29, 0.0 }
 0x126   :  { %v682_v31 = vpack.c.bf16 %v665_v30, %v665_v30 }
 0x128   :  { %2168 = vmatmul.mubr.bf16.vlgmr.msra.gmra.mrb[8].mxu1 %v682_v31 }
 0x129   :  { %2187 = vmatprep.mubr.msk.bf16.mxu1 %vm2441_vm0, %v2440_v41  ;;  %2184 = vmatpush3.bf16.msra.mxu1 %v2320_v34  ;;  %v2328_v34 = vld [vmem:[%s3093_s18 + $0x10] sm:$0xff]  }
 0x12a   :  { %2185 = vmatprep.subr.bf16.mxu1 %v2440_v41 }
 0x12d   :  { %2186 = vmatpush3.bf16.msra.mxu1 %v2321_v44  ;;  %v2350_v44 = vld [vmem:[%s3095_s20 + $0xac] ss:$28 sps:$4 sm:$0xff]  }
 0x12e   :  { %2191 = vmatprep.subr.bf16.mxu1 %v2440_v41 }
 0x1fb   :  { %v772_v36 = vpop.f32.mrb[8].mxu1 }
 0x1fc   :  { %v773_v37 = vadd.f32 %v1937_v35, %v772_v36  ;;  %v2169_v38 = vpop.f32.mrb[9].mxu1  ;;  %v2329_v35 = vld [vmem:[%s3093_s18 + $0x18] sm:$0xff]  }
 0x1fd   :  { %v775_v39 = vpop.f32.mrb[10].mxu1  ;;  %v2330_v36 = vld [vmem:[%s3095_s20] ss:$28 sps:$4 sm:$0xff]   ;;  %v2335_v38 = vld [vmem:[%s3095_s20 + $0xc] ss:$28 sps:$4 sm:$0xff]  }
 0x1fe   :  { %v778_v40 = vmax.f32 %v773_v37, 0.0  ;;  %v2170_v42 = vpop.f32.mrb[11].mxu1  ;;  %v2332_v37 = vld [vmem:[%s3095_s20 + $0x4] ss:$28 sps:$4 sm:$0xff]   ;;  %v2338_v39 = vld [vmem:[%s3095_s20 + $0x3c] ss:$28 sps:$4 sm:$0xff]  }
 0x1ff   :  { %v2344_v42 = vld [vmem:[%s3095_s20 + $0x74] ss:$28 sps:$4 sm:$0xff]  }
 0x200   :  { %v787_v43 = vpack.c.bf16 %v778_v40, %v778_v40  ;;  %v2336_v40 = vld [vmem:[%s3095_s20 + $0x38] ss:$28 sps:$4 sm:$0xff]  }
 0x202   :  { %2180 = vmatmul.mubr.msk.bf16.vlgmr.msra.gmra.mrb[8].mxu0 %vm819_vm2, %v787_v43  ;;  %v2342_v43 = vld [vmem:[%s3095_s20 + $0x70] ss:$28 sps:$4 sm:$0xff]  }
 0x203   :  { %2205 = vmatprep.mubr.msk.bf16.mxu0 %vm2441_vm0, %v2440_v41  ;;  %2204 = vmatpush3.bf16.msra.mxu0 %v2323_v0  ;;  %v2345_v0 = vld [vmem:[%s3095_s20 + $0x78] ss:$28 sps:$4 sm:$0xff]  }
 0x204   :  { %2217 = vmatprep.subr.bf16.mxu0 %v2440_v41 }
 0x2d5   :  { %v857_v46 = vpop.f32.mrb[8].mxu0 }
 0x2d6   :  { %v858_v47 = vadd.f32 %v1946_v45, %v857_v46  ;;  %v2181_v48 = vpop.f32.mrb[9].mxu0  ;;  %v2348_v45 = vld [vmem:[%s3095_s20 + $0xa8] ss:$28 sps:$4 sm:$0xff]  }
 0x2d7   :  { %v860_v49 = vpop.f32.mrb[10].mxu0  ;;  %v2356_v46 = vld [vmem:[%s3095_s20 + $0xe4] ss:$28 sps:$4 sm:$0xff]   ;;  %v2362_v48 = vld [vmem:[%s3095_s20 + $0x11c] ss:$28 sps:$4 sm:$0xff]  }
 0x2d8   :  { %v863_v50 = vmax.f32 %v858_v47, 0.0  ;;  %v2182_v51 = vpop.f32.mrb[11].mxu0  ;;  %v2354_v47 = vld [vmem:[%s3095_s20 + $0xe0] ss:$28 sps:$4 sm:$0xff]   ;;  %v2360_v49 = vld [vmem:[%s3095_s20 + $0x118] ss:$28 sps:$4 sm:$0xff]  }
 0x2d9   :  { %v2366_v51 = vld [vmem:[%s3095_s20 + $0x150] ss:$28 sps:$4 sm:$0xff]  }
 0x2da   :  { %v868_v53 = vpack.c.bf16 %v863_v50, %v863_v50  ;;  %v2368_v50 = vld [vmem:[%s3095_s20 + $0x154] ss:$28 sps:$4 sm:$0xff]  }
 0x2dc   :  { %2188 = vmatmul.mubr.msk.bf16.vlgmr.msra.gmra.mrb[12].mxu1 %vm888_vm3, %v868_v53 }
 0x2dd   :  { %2192 = vmatpush3.bf16.msra.mxu1 %v2322_v52  ;;  %2193 = vmatprep.mubr.msk.bf16.mxu1 %vm2441_vm0, %v2440_v41  ;;  %v1964_v52 = vld [vmem:[%s3096_s17] ss:$0 sm:$0xff] }
 0x2de   :  { %2197 = vmatprep.subr.bf16.mxu1 %v2440_v41 }
 0x3af   :  { %v926_v55 = vpop.f32.mrb[12].mxu1 }
 0x3b0   :  { %v927_v56 = vadd.f32 %v1952_v54, %v926_v55  ;;  %v2189_v57 = vpop.f32.mrb[13].mxu1 }
 0x3b1   :  { %v929_v58 = vpop.f32.mrb[14].mxu1 }
 0x3b2   :  { %v932_v59 = vmax.f32 %v927_v56, 0.0  ;;  %v2190_v60 = vpop.f32.mrb[15].mxu1 }
 0x3b4   :  { %v935_v61 = vpack.c.bf16 %v932_v59, %v932_v59  ;;  %v2333_v59 = vld [vmem:[%s3095_s20 + $0x8] ss:$28 sps:$4 sm:$0xff]  }
 0x3b6   :  { %2194 = vmatmul.mubr.msk.bf16.vlgmr.msra.gmra.mrb[16].mxu1 %vm501_vm1, %v935_v61  ;;  %v2341_v61 = vld [vmem:[%s3095_s20 + $0x44] ss:$28 sps:$4 sm:$0xff]  }
 0x3b7   :  { %2199 = vmatprep.mubr.msk.bf16.mxu1 %vm2441_vm0, %v2440_v41  ;;  %2198 = vmatpush3.bf16.msra.mxu1 %v1014_v63  ;;  %v2347_v63 = vld [vmem:[%s3095_s20 + $0x7c] ss:$28 sps:$4 sm:$0xff]  }
 0x3b8   :  { %2209 = vmatprep.subr.bf16.mxu1 %v2440_v41 }
 0x489   :  { %v986_v2 = vpop.f32.mrb[16].mxu1 }
 0x48a   :  { %v987_v3 = vadd.f32 %v1956_v1, %v986_v2  ;;  %v2195_v4 = vpop.f32.mrb[17].mxu1  ;;  %v2353_v1 = vld [vmem:[%s3095_s20 + $0xb4] ss:$28 sps:$4 sm:$0xff]  }
 0x48b   :  { %v989_v5 = vpop.f32.mrb[18].mxu1  ;;  %v2351_v2 = vld [vmem:[%s3095_s20 + $0xb0] ss:$28 sps:$4 sm:$0xff]   ;;  %v2357_v4 = vld [vmem:[%s3095_s20 + $0xe8] ss:$28 sps:$4 sm:$0xff]  }
 0x48c   :  { %993 = vst.msk [vmem:[%s3089_s22] sm:$0xff] %vm992_vm5, %v987_v3  ;;  %v994_v6 = vmul.f32 0.5, %v987_v3  ;;  %v2196_v7 = vpop.f32.mrb[19].mxu1  ;;  %v2365_v5 = vld [vmem:[%s3095_s20 + $0x124] ss:$28 sps:$4 sm:$0xff]  }
 0x48d   :  { %v2371_v7 = vld [vmem:[%s3095_s20 + $0x15c] ss:$28 sps:$4 sm:$0xff]  }
 0x48e   :  { %v995_v8 = vmul.f32 1.442695, %v994_v6  ;;  %v2363_v6 = vld [vmem:[%s3095_s20 + $0x120] ss:$28 sps:$4 sm:$0xff]  }
 0x490   :  { %2410 = vpow2.f32 %v995_v8  ;;  %v2369_v8 = vld [vmem:[%s3095_s20 + $0x158] ss:$28 sps:$4 sm:$0xff]  }
 0x49a   :  { %v2411_v10 = vpop.eup %2410 }
 0x49b   :  { %v998_v11 = vmul.f32 %v2411_v10, %v997_v9  ;;  %v2374_v9 = vld [vmem:[%s3095_s20 + $0x18c] ss:$28 sps:$4 sm:$0xff]   ;;  %v2377_v10 = vld [vmem:[%s3095_s20 + $0x194] ss:$28 sps:$4 sm:$0xff]  }
 0x49d   :  { %v999_v12 = vadd.f32 %v998_v11, %v987_v3  ;;  %v2359_v3 = vld [vmem:[%s3095_s20 + $0xec] ss:$28 sps:$4 sm:$0xff]  }
 0x49e   :  { %v2372_v11 = vld [vmem:[%s3095_s20 + $0x188] ss:$28 sps:$4 sm:$0xff]  }
 0x49f   :  { %v1001_v13 = vpack.c.bf16 %v999_v12, %v999_v12  ;;  %v2375_v12 = vld [vmem:[%s3095_s20 + $0x190] ss:$28 sps:$4 sm:$0xff]  }
 0x4a1   :  { %2200 = vmatmul.mubr.msk.bf16.vlgmr.msra.gmra.mrb[20].mxu1 %vm992_vm5, %v1001_v13  ;;  %v2380_v13 = vld [vmem:[%s3095_s20 + $0x14] ss:$28 sps:$4 sm:$0xff]  }
 0x4a2   :  { %2213 = vmatprep.mubr.msk.bf16.mxu1 %vm2441_vm0, %v2440_v41  ;;  %2210 = vmatpush3.bf16.msra.mxu1 %v2324_v14  ;;  %v2442_v14 = vmov 0  }
 0x4a3   :  { %2211 = vmatprep.subr.bf16.mxu1 %v2440_v41 }
 0x4a6   :  { %2212 = vmatpush3.bf16.msra.mxu1 %v2325_v23  ;;  %v2381_v23 = vld [vmem:[%s3095_s20 + $0x18] ss:$28 sps:$4 sm:$0xff]  }
 0x4a7   :  { %1659 = vmatprep.subr.bf16.mxu1 %v2332_v37  ;;  %v2400_v37 = vld [vmem:[%s3095_s20 + $0x12c] ss:$28 sps:$4 sm:$0xff]  }
 0x574   :  { %v1050_v16 = vpop.f32.mrb[20].mxu1 }
 0x575   :  { %v1051_v17 = vadd.f32 %v1959_v15, %v1050_v16  ;;  %v2201_v18 = vpop.f32.mrb[21].mxu1  ;;  %v1968_v15 = vld [vmem:[%s3097_s19] ss:$0 sm:$0xff] }
 0x576   :  { %v1053_v19 = vpop.f32.mrb[22].mxu1 }
 0x577   :  { %v1056_v20 = vmax.f32 %v1051_v17, 0.0  ;;  %v2202_v21 = vpop.f32.mrb[23].mxu1 }
 0x579   :  { %v1059_v22 = vpack.c.bf16 %v1056_v20, %v1056_v20 }
 0x57b   :  { %2206 = vmatmul.mubr.msk.bf16.vlgmr.msra.gmra.mrb[12].mxu0 %vm501_vm1, %v1059_v22  ;;  %v2378_v22 = vld [vmem:[%s3095_s20 + $0x10] ss:$28 sps:$4 sm:$0xff]  }
 0x57c   :  { %2225 = vmatprep.mubr.msk.bf16.mxu0 %vm2441_vm0, %v2440_v41  ;;  %2218 = vmatpush3.bf16.msra.mxu0 %v2326_v24 }
 0x57d   :  { %2219 = vmatprep.subr.bf16.mxu0 %v2440_v41 }
 0x580   :  { %2220 = vmatpush3.bf16.msra.mxu0 %v2327_v25  ;;  %v2384_v25 = vld [vmem:[%s3095_s20 + $0x4c] ss:$28 sps:$4 sm:$0xff]  }
 0x581   :  { %2221 = vmatprep.subr.bf16.mxu0 %v2440_v41 }
 0x584   :  { %2222 = vmatpush3.bf16.msra.mxu0 %v2328_v34  ;;  %v2396_v34 = vld [vmem:[%s3095_s20 + $0xf4] ss:$28 sps:$4 sm:$0xff]  }
 0x585   :  { %2223 = vmatprep.subr.bf16.mxu0 %v2440_v41 }
 0x588   :  { %2224 = vmatpush3.bf16.msra.mxu0 %v2329_v35  ;;  %v2394_v35 = vld [vmem:[%s3095_s20 + $0xf0] ss:$28 sps:$4 sm:$0xff]  }
 0x589   :  { %1700 = vmatprep.subr.bf16.mxu0 %v2335_v38  ;;  %v2398_v38 = vld [vmem:[%s3095_s20 + $0x128] ss:$28 sps:$4 sm:$0xff]  }
 0x64e   :  { %v1110_v27 = vpop.f32.mrb[12].mxu0 }
 0x64f   :  { %v1111_v28 = vadd.f32 %v1961_v26, %v1110_v27  ;;  %v2207_v29 = vpop.f32.mrb[13].mxu0  ;;  %v2382_v26 = vld [vmem:[%s3095_s20 + $0x48] ss:$28 sps:$4 sm:$0xff]   ;;  %v2385_v27 = vld [vmem:[%s3095_s20 + $0x50] ss:$28 sps:$4 sm:$0xff]  }
 0x650   :  { %v1113_v30 = vpop.f32.mrb[14].mxu0  ;;  %v2386_v29 = vld [vmem:[%s3095_s20 + $0x80] ss:$28 sps:$4 sm:$0xff]  }
 0x651   :  { %v1116_v31 = vmax.f32 %v1111_v28, 0.0  ;;  %v2208_v32 = vpop.f32.mrb[15].mxu0  ;;  %v2388_v28 = vld [vmem:[%s3095_s20 + $0x84] ss:$28 sps:$4 sm:$0xff]  }
 0x652   :  { %v2389_v30 = vld [vmem:[%s3095_s20 + $0x88] ss:$28 sps:$4 sm:$0xff]   ;;  %v2390_v32 = vld [vmem:[%s3095_s20 + $0xb8] ss:$28 sps:$4 sm:$0xff]  }
 0x653   :  { %v1121_v33 = vpack.c.bf16 %v1116_v31, %v1116_v31  ;;  %v2392_v31 = vld [vmem:[%s3095_s20 + $0xbc] ss:$28 sps:$4 sm:$0xff]  }
 0x655   :  { %2214 = vmatmul.mubr.msk.bf16.vlgmr.msra.gmra.mrb[24].mxu1 %vm888_vm3, %v1121_v33  ;;  %v2393_v33 = vld [vmem:[%s3095_s20 + $0xc0] ss:$28 sps:$4 sm:$0xff]  }
 0x656   :  { %1660 = vmatpush1.bf16.msra.mxu1 %v2330_v36  ;;  %1691 = vmatprep.mubr.bf16.mxu1 %v2442_v14  ;;  %v2397_v36 = vld [vmem:[%s3095_s20 + $0xf8] ss:$28 sps:$4 sm:$0xff]  }
 0x657   :  { %1661 = vmatprep.subr.bf16.mxu1 %v2338_v39  ;;  %v2401_v39 = vld [vmem:[%s3095_s20 + $0x130] ss:$28 sps:$4 sm:$0xff]  }
 0x65a   :  { %1662 = vmatpush1.bf16.msra.mxu1 %v2336_v40  ;;  %v2404_v40 = vld [vmem:[%s3095_s20 + $0x164] ss:$28 sps:$4 sm:$0xff]  }
 0x65b   :  { %1663 = vmatprep.subr.bf16.mxu1 %v2344_v42  ;;  %v2402_v42 = vld [vmem:[%s3095_s20 + $0x160] ss:$28 sps:$4 sm:$0xff]  }
 0x65e   :  { %1664 = vmatpush1.bf16.msra.mxu1 %v2342_v43  ;;  %v2405_v43 = vld [vmem:[%s3095_s20 + $0x168] ss:$28 sps:$4 sm:$0xff]  }
 0x65f   :  { %1665 = vmatprep.subr.bf16.mxu1 %v2350_v44  ;;  %v2408_v44 = vld [vmem:[%s3095_s20 + $0x19c] ss:$28 sps:$4 sm:$0xff]  }
 0x662   :  { %1666 = vmatpush1.bf16.msra.mxu1 %v2348_v45  ;;  %v2406_v45 = vld [vmem:[%s3095_s20 + $0x198] ss:$28 sps:$4 sm:$0xff]  }
 0x663   :  { %1667 = vmatprep.subr.bf16.mxu1 %v2356_v46  ;;  %v2409_v46 = vld [vmem:[%s3095_s20 + $0x1a0] ss:$28 sps:$4 sm:$0xff]  }
 0x666   :  { %1668 = vmatpush1.bf16.msra.mxu1 %v2354_v47  ;;  %v1336_v47 = vlaneseq }
 0x667   :  { %1669 = vmatprep.subr.bf16.mxu1 %v2362_v48 }
 0x668   :  { %v1337_v48 = vshrl.u32 %v1336_v47, 7 }
 0x66a   :  { %1670 = vmatpush1.bf16.msra.mxu1 %v2360_v49  ;;  %v1338_v49 = vsub.s32 0, %v1337_v48 }
 0x66b   :  { %1671 = vmatprep.subr.bf16.mxu1 %v2368_v50  ;;  %v1346_v50 = vsub.s32 2, %v1337_v48 }
 0x66e   :  { %1672 = vmatpush1.bf16.msra.mxu1 %v2366_v51  ;;  %v1334_v51 = vld [vmem:[%s3098_s21] sm:$0x7f] }
 0x66f   :  { %1673 = vmatprep.subr.bf16.mxu1 %v2374_v9 }
 0x672   :  { %1674 = vmatpush1.bf16.msra.mxu1 %v2372_v11 }
 0x673   :  { %1741 = vmatprep.subr.bf16.mxu1 %v2380_v13 }
 0x728   :  { %v1178_v53 = vpop.f32.mrb[24].mxu1 }
 0x729   :  { %v1179_v54 = vadd.f32 %v1964_v52, %v1178_v53  ;;  %v2215_v55 = vpop.f32.mrb[25].mxu1  ;;  %v1342_v52 = vsub.s32 1, %v1337_v48  ;;  %v1350_v53 = vsub.s32 3, %v1337_v48 }
 0x72a   :  { %v1181_v56 = vpop.f32.mrb[26].mxu1  ;;  %v1347_v55 = vrot.slane %v1334_v51, %v1346_v50 }
 0x72b   :  { %v1184_v57 = vmax.f32 %v1179_v54, 0.0  ;;  %v2216_v58 = vpop.f32.mrb[27].mxu1  ;;  %v1339_v54 = vrot.slane %v1334_v51, %v1338_v49  ;;  %v1343_v56 = vrot.slane %v1334_v51, %v1342_v52 }
 0x72d   :  { %v1193_v60 = vpack.c.bf16 %v1184_v57, %v1184_v57  ;;  %v1351_v57 = vrot.slane %v1334_v51, %v1350_v53 }
 0x72f   :  { %2226 = vmatmul.mubr.msk.bf16.vlgmr.msra.gmra.mrb[16].mxu0 %vm819_vm2, %v1193_v60 }
 0x730   :  { %1701 = vmatpush1.bf16.msra.mxu0 %v2333_v59  ;;  %1732 = vmatprep.mubr.bf16.mxu0 %v2442_v14 }
 0x731   :  { %1702 = vmatprep.subr.bf16.mxu0 %v2341_v61 }
 0x734   :  { %1703 = vmatpush1.bf16.msra.mxu0 %v2339_v62 }
 0x735   :  { %1704 = vmatprep.subr.bf16.mxu0 %v2347_v63 }
 0x738   :  { %1705 = vmatpush1.bf16.msra.mxu0 %v2345_v0 }
 0x739   :  { %1706 = vmatprep.subr.bf16.mxu0 %v2353_v1 }
 0x73c   :  { %1707 = vmatpush1.bf16.msra.mxu0 %v2351_v2 }
 0x73d   :  { %1708 = vmatprep.subr.bf16.mxu0 %v2359_v3 }
 0x740   :  { %1709 = vmatpush1.bf16.msra.mxu0 %v2357_v4 }
 0x741   :  { %1710 = vmatprep.subr.bf16.mxu0 %v2365_v5 }
 0x744   :  { %1711 = vmatpush1.bf16.msra.mxu0 %v2363_v6 }
 0x745   :  { %1712 = vmatprep.subr.bf16.mxu0 %v2371_v7 }
 0x748   :  { %1713 = vmatpush1.bf16.msra.mxu0 %v2369_v8 }
 0x749   :  { %1714 = vmatprep.subr.bf16.mxu0 %v2377_v10 }
 0x74c   :  { %1715 = vmatpush1.bf16.msra.mxu0 %v2375_v12 }
 0x74d   :  { %2229 = vmatprep.subr.bf16.mxu0 %v2440_v41 }
 0x802   :  { %v1262_v16 = vpop.f32.mrb[16].mxu0 }
 0x803   :  { %v1263_v17 = vadd.f32 %v1968_v15, %v1262_v16  ;;  %v2227_v18 = vpop.f32.mrb[17].mxu0 }
 0x804   :  { %v1265_v19 = vpop.f32.mrb[18].mxu0  ;;  %v1362_v18 = vsub.s32 6, %v1337_v48 }
 0x805   :  { %v1268_v20 = vmax.f32 %v1263_v17, 0.0  ;;  %v2228_v21 = vpop.f32.mrb[19].mxu0  ;;  %v1354_v17 = vsub.s32 4, %v1337_v48  ;;  %v1358_v19 = vsub.s32 5, %v1337_v48 }
 0x807   :  { %v1333_v24 = vpack.c.bf16 %v1268_v20, %v1268_v20 }
 0x809   :  { %1692 = vmatmul.mubr.bf16.vlgmr.msra.gmra.mrb[28].mxu1 %v1333_v24  ;;  %1733 = vmatmul.mubr.bf16.vlgmr.msra.gmra.mrb[20].mxu0 %v1333_v24 }
 0x80a   :  { %1742 = vmatpush1.bf16.msra.mxu1 %v2378_v22  ;;  %2230 = vmatpush3.bf16.msra.mxu0 %v2381_v23  ;;  %v1355_v22 = vrot.slane %v1334_v51, %v1354_v17  ;;  %v1363_v23 = vrot.slane %v1334_v51, %v1362_v18 }
 0x80b   :  { %1743 = vmatprep.subr.bf16.mxu1 %v2384_v25  ;;  %2231 = vmatprep.subr.bf16.mxu0 %v2440_v41  ;;  %v1359_v25 = vrot.slane %v1334_v51, %v1358_v19 }
 0x80c   :  { %1773 = vmatprep.mubr.bf16.mxu1 %v2442_v14  ;;  %2245 = vmatprep.mubr.msk.bf16.mxu0 %vm2441_vm0, %v2440_v41 }
 0x80e   :  { %1744 = vmatpush1.bf16.msra.mxu1 %v2382_v26  ;;  %2232 = vmatpush3.bf16.msra.mxu0 %v2385_v27 }
 0x80f   :  { %1745 = vmatprep.subr.bf16.mxu1 %v2388_v28  ;;  %2233 = vmatprep.subr.bf16.mxu0 %v2440_v41 }
 0x812   :  { %1746 = vmatpush1.bf16.msra.mxu1 %v2386_v29  ;;  %2234 = vmatpush3.bf16.msra.mxu0 %v2389_v30 }
 0x813   :  { %1747 = vmatprep.subr.bf16.mxu1 %v2392_v31  ;;  %2235 = vmatprep.subr.bf16.mxu0 %v2440_v41 }
 0x816   :  { %1748 = vmatpush1.bf16.msra.mxu1 %v2390_v32  ;;  %2236 = vmatpush3.bf16.msra.mxu0 %v2393_v33 }
 0x817   :  { %1749 = vmatprep.subr.bf16.mxu1 %v2396_v34  ;;  %2237 = vmatprep.subr.bf16.mxu0 %v2440_v41 }
 0x81a   :  { %1750 = vmatpush1.bf16.msra.mxu1 %v2394_v35  ;;  %2238 = vmatpush3.bf16.msra.mxu0 %v2397_v36 }
 0x81b   :  { %1751 = vmatprep.subr.bf16.mxu1 %v2400_v37  ;;  %2239 = vmatprep.subr.bf16.mxu0 %v2440_v41 }
 0x81e   :  { %1752 = vmatpush1.bf16.msra.mxu1 %v2398_v38  ;;  %2240 = vmatpush3.bf16.msra.mxu0 %v2401_v39 }
 0x81f   :  { %1753 = vmatprep.subr.bf16.mxu1 %v2404_v40  ;;  %2241 = vmatprep.subr.bf16.mxu0 %v2440_v41 }
 0x822   :  { %1754 = vmatpush1.bf16.msra.mxu1 %v2402_v42  ;;  %2242 = vmatpush3.bf16.msra.mxu0 %v2405_v43 }
 0x823   :  { %1755 = vmatprep.subr.bf16.mxu1 %v2408_v44  ;;  %2243 = vmatprep.subr.bf16.mxu0 %v2440_v41 }
 0x826   :  { %1756 = vmatpush1.bf16.msra.mxu1 %v2406_v45  ;;  %2244 = vmatpush3.bf16.msra.mxu0 %v2409_v46 }
 0x829   :  { %1774 = vmatmul.mubr.bf16.vlgmr.msra.gmra.mrb[32].mxu1 %v1333_v24  ;;  %2246 = vmatmul.mubr.bf16.vlgmr.msra.gmra.mrb[24].mxu0 %v1333_v24 }
 0x8dc   :  { %v1693_v58 = vpop.f32.mrb[28].mxu1  ;;  %v1734_v41 = vpop.f32.mrb[20].mxu0 }
 0x8dd   :  { %v1694_v59 = vadd.f32 %v1693_v58, %v1339_v54  ;;  %v1735_v60 = vadd.f32 %v1734_v41, %v1347_v55  ;;  %v1695_v61 = vpop.f32.mrb[29].mxu1  ;;  %v1736_v62 = vpop.f32.mrb[21].mxu0 }
 0x8de   :  { %v1696_v63 = vadd.f32 %v1695_v61, %v1343_v56  ;;  %v1737_v0 = vadd.f32 %v1736_v62, %v1351_v57  ;;  %v1697_v1 = vpop.f32.mrb[30].mxu1  ;;  %v1738_v2 = vpop.f32.mrb[22].mxu0 }
 0x8df   :  { %v2030_v3 = vmul.f32 -1.442695, %v1694_v59  ;;  %v2032_v4 = vmul.f32 -1.442695, %v1735_v60  ;;  %v1698_v5 = vpop.f32.mrb[31].mxu1  ;;  %v1739_v6 = vpop.f32.mrb[23].mxu0 }
 0x8e0   :  { %v2031_v7 = vmul.f32 -1.442695, %v1696_v63  ;;  %v2033_v8 = vmul.f32 -1.442695, %v1737_v0 }
 0x8e1   :  { %2412 = vpow2.f32 %v2030_v3 }
 0x8e2   :  { %2414 = vpow2.f32 %v2032_v4 }
 0x8e3   :  { %2416 = vpow2.f32 %v2031_v7 }
 0x8e4   :  { %2418 = vpow2.f32 %v2033_v8 }
 0x8eb   :  { %v2413_v9 = vpop.eup %2412 }
 0x8ec   :  { %v2415_v10 = vpop.eup %2414  ;;  %v1843_v11 = vadd.f32 1.0, %v2413_v9 }
 0x8ed   :  { %v2417_v12 = vpop.eup %2416  ;;  %v1845_v13 = vadd.f32 1.0, %v2415_v10 }
 0x8ee   :  { %v2419_v14 = vpop.eup %2418  ;;  %2420 = vrcp.f32 %v1843_v11  ;;  %v1844_v15 = vadd.f32 1.0, %v2417_v12 }
 0x8ef   :  { %2422 = vrcp.f32 %v1845_v13  ;;  %v1846_v16 = vadd.f32 1.0, %v2419_v14 }
 0x8f0   :  { %2424 = vrcp.f32 %v1844_v15 }
 0x8f1   :  { %2426 = vrcp.f32 %v1846_v16 }
 0x8f8   :  { %v2421_v20 = vpop.eup %2420 }
 0x8f9   :  { %v2423_v21 = vpop.eup %2422  ;;  %1864 = vst [vmem:[%s3099_s23] sm:$0xff] %v2421_v20 }
 0x8fa   :  { %v2425_v24 = vpop.eup %2424  ;;  %1866 = vst [vmem:[%s3099_s23 + $0x10] sm:$0xff] %v2423_v21 }
 0x8fb   :  { %v2427_v26 = vpop.eup %2426  ;;  %1865 = vst [vmem:[%s3099_s23 + $0x8] sm:$0xff] %v2425_v24 }
 0x8fc   :  { %1867 = vst [vmem:[%s3099_s23 + $0x18] sm:$0xff] %v2427_v26  ;;  %v1775_v27 = vpop.f32.mrb[32].mxu1  ;;  %v1816_v28 = vpop.f32.mrb[24].mxu0 }
 0x8fd   :  { %v1776_v29 = vadd.f32 %v1775_v27, %v1355_v22  ;;  %v1817_v30 = vadd.f32 %v1816_v28, %v1363_v23  ;;  %v1777_v31 = vpop.f32.mrb[33].mxu1  ;;  %v2247_v32 = vpop.f32.mrb[25].mxu0 }
 0x8fe   :  { %v1778_v33 = vadd.f32 %v1777_v31, %v1359_v25  ;;  %v1779_v34 = vpop.f32.mrb[34].mxu1  ;;  %v1819_v35 = vpop.f32.mrb[26].mxu0 }
 0x8ff   :  { %v2034_v36 = vmul.f32 -1.442695, %v1776_v29  ;;  %v2036_v37 = vmul.f32 -1.442695, %v1817_v30  ;;  %v1780_v38 = vpop.f32.mrb[35].mxu1  ;;  %v2248_v39 = vpop.f32.mrb[27].mxu0 }
 0x900   :  { %v2035_v40 = vmul.f32 -1.442695, %v1778_v33 }
 0x901   :  { %2428 = vpow2.f32 %v2034_v36 }
 0x902   :  { %2430 = vpow2.f32 %v2036_v37 }
 0x903   :  { %2432 = vpow2.f32 %v2035_v40 }
 0x90b   :  { %v2429_v42 = vpop.eup %2428 }
 0x90c   :  { %v2431_v43 = vpop.eup %2430  ;;  %v1847_v44 = vadd.f32 1.0, %v2429_v42 }
 0x90d   :  { %v2433_v45 = vpop.eup %2432  ;;  %v1849_v46 = vadd.f32 1.0, %v2431_v43 }
 0x90e   :  { %2434 = vrcp.f32 %v1847_v44  ;;  %v1848_v47 = vadd.f32 1.0, %v2433_v45 }
 0x90f   :  { %2436 = vrcp.f32 %v1849_v46 }
 0x910   :  { %2438 = vrcp.f32 %v1848_v47 }
 0x918   :  { %v2435_v48 = vpop.eup %2434 }
 0x919   :  { %v2437_v49 = vpop.eup %2436  ;;  %1868 = vst [vmem:[%s3099_s23 + $0x20] sm:$0xff] %v2435_v48 }
 0x91a   :  { %v2439_v50 = vpop.eup %2438  ;;  %1870 = vst.msk [vmem:[%s3099_s23 + $0x30] sm:$0xff] %vm501_vm1, %v2437_v49 }
 0x91b   :  { %1869 = vst [vmem:[%s3099_s23 + $0x28] sm:$0xff] %v2439_v50 }

</bundles_post_ra>
